<compile_context>
chip_gen: v5e
topology: v5e:2x2
jax: 0.10.0
libtpu: 0.0.40
codegen_flags: <defaults>
</compile_context>

<pallas_src>
import jax
import jax.numpy as jnp
import numpy as np
from jax.experimental import pallas as pl
from jax.experimental.pallas import tpu as pltpu

EPS = 0.1
LANE = 128  # TPU lane width; batch tiles are always a multiple of this.


def _dot(a, b):
    """Standard (m,k)@(k,n) MXU dot, f32 accumulate, default precision."""
    return jax.lax.dot_general(a, b, (((1,), (0,)), ((), ())),
                               preferred_element_type=jnp.float32)


def make_lnn_kernel(num_layers, eps):
    n_tanh = num_layers - 1          # number of tanh layers
    n_mid = n_tanh - 1               # hidden->hidden tanh layers

    def kernel(*refs):
        x_ref, w0_ref, b0_ref = refs[0], refs[1], refs[2]
        mid_refs = refs[3:3 + 3 * n_mid]          # (W, W^T, b) per mid layer
        wlast_ref = refs[3 + 3 * n_mid]           # (H, 1) last-layer weight
        o_ref = refs[3 + 3 * n_mid + 1]

        x = x_ref[...]                            # (2, bb) f32, batch on lanes
        bb = x.shape[1]
        q = x[0:1, :]                             # (1, bb)
        v = x[1:2, :]                             # (1, bb)

        w0 = w0_ref[...]                          # (H, 2) torch layout
        b0 = b0_ref[...]                          # (H, 1)
        hidden = w0.shape[0]
        w0q = w0[:, 0:1]                          # (H, 1)
        w0v = w0[:, 1:2]                          # (H, 1)

        # ---- layer 0 (input dim 2): lane-dense f32 VPU broadcast-FMAs ----
        # Forward-mode tangent direction is e1 = (0, 1); the tangent after this
        # linear layer is simply column 1 of W0 broadcast over the batch lanes.
        z = w0q * q + w0v * v + b0                # (H, bb)
        a = jnp.tanh(z)
        at = (1.0 - a * a) * jnp.broadcast_to(w0v, (hidden, bb))

        saved = [(a, at)]
        # ---- hidden tanh layers: fused primal/tangent MXU dot W @ [a|at] ----
        for l in range(n_mid):
            w = mid_refs[3 * l][...]              # (H, H)
            b = mid_refs[3 * l + 2][...]          # (H, 1)
            ab = jnp.concatenate([a, at], axis=1)             # (H, 2*bb)
            zz = _dot(w, ab)                                   # (H, 2*bb)
            a = jnp.tanh(zz[:, :bb] + b)                       # bias only on z
            at = (1.0 - a * a) * zz[:, bb:]
            saved.append((a, at))

        wl = wlast_ref[...]                       # (H, 1): dL/da_last column

        # ---- reverse pass (peeled first step: gt == 0 at the deepest layer) ----
        a_l, at_l = saved[n_tanh - 1]
        g = jnp.broadcast_to(wl, (hidden, bb))
        s = 1.0 - a_l * a_l
        dz = g * s
        dzt = g * (-2.0 * a_l * at_l)             # gt*s term is identically 0

        for l in range(n_tanh - 1, 0, -1):
            wt = mid_refs[3 * (l - 1) + 1][...]   # W_l^T, (H, H)
            dd = jnp.concatenate([dz, dzt], axis=1)            # (H, 2*bb)
            gg = _dot(wt, dd)                                  # (H, 2*bb)
            g, gt = gg[:, :bb], gg[:, bb:]
            a_l, at_l = saved[l - 1]
            s = 1.0 - a_l * a_l
            st = -2.0 * a_l * at_l
            dz = g * s
            dzt = gt * s + g * st

        # ---- layer-0 projection onto [q, v]: f32 VPU muls + sublane reduces ----
        dL_dq   = jnp.sum(dz  * w0q, axis=0, keepdims=True)    # (1, bb)
        d2L_dqv = jnp.sum(dzt * w0q, axis=0, keepdims=True)    # H[0,1] == H[1,0]
        d2L_dv2 = jnp.sum(dzt * w0v, axis=0, keepdims=True)    # H[1,1]

        acc = (dL_dq - d2L_dqv * v) / (d2L_dv2 + eps)           # (1, bb)

        # Assemble [v; acc] as one full-tile, lane-dense store.
        row = jax.lax.broadcasted_iota(jnp.int32, (2, bb), 0)
        o_ref[...] = jnp.where(row == 0, v, acc).astype(o_ref.dtype)

    return kernel


def _choose_bm(B, hidden, n_tanh, weight_bytes):
    """Pick a lane-aligned, VMEM-budget-aware batch tile and the padded batch."""
    B_pad = -(-B // LANE) * LANE
    # f32 residuals (a, at per tanh layer) + working temps, per batch element.
    per_elem = (2 * n_tanh + 10) * hidden * 4
    # Conservative budget: fits the default scoped VMEM on v6e/v7x (32 MiB)
    # with weights (double-buffered by the pipeline) taken out first.
    avail = max(20 * 2**20 - 2 * weight_bytes, 4 * 2**20)
    cap = max(LANE, (avail // per_elem) // LANE * LANE)
    cap = min(cap, 512)
    if B_pad <= cap:
        if B_pad >= 2 * LANE:
            bm = max(LANE, (B_pad // 2) // LANE * LANE)   # >= 2 grid steps (v7x)
        else:
            bm = B_pad
    else:
        bm = cap
    B_pad = -(-B_pad // bm) * bm
    return bm, B_pad


def init_mlp_params(key, input_dim, hidden_dim, num_layers, scale=0.5):
    """Linear init, uniform +/- scale/sqrt(fan_in) (PyTorch weight layout)."""
    dims = [input_dim] + [hidden_dim] * (num_layers - 1) + [1]
    params = []
    for l in range(num_layers):
        in_d, out_d = dims[l], dims[l + 1]
        key, kw, kb = jax.random.split(key, 3)
        bound = scale / np.sqrt(in_d)
        W = jax.random.uniform(kw, (out_d, in_d), jnp.float32, -bound, bound)
        b = jax.random.uniform(kb, (out_d,), jnp.float32, -bound, bound)
        params.append((W, b))
    return params


def lnn_forward_pallas(t, x, params, eps=EPS):
    """Pallas implementation of LNN.forward(t, x). `t` is unused (as in torch)."""
    del t
    B, d = x.shape
    assert d == 2, "LNN forward assumes input_dim == 2 (columns [q, v])"
    num_layers = len(params)
    assert num_layers >= 2
    n_tanh = num_layers - 1
    hidden = params[0][0].shape[0]

    # Weight staging: layer 0 as (H, 2) + (H, 1) bias, each mid layer as
    # (W, W^T, b) so both forward and reverse dots are standard MXU dots,
    # last layer as an (H, 1) column (its bias does not affect grad/Hessian).
    W0, b0 = params[0]
    w0 = jnp.asarray(W0, jnp.float32)                              # (H, 2)
    b0c = jnp.asarray(b0, jnp.float32).reshape(hidden, 1)          # (H, 1)
    weight_args = [w0, b0c]
    for l in range(1, num_layers - 1):
        W, b = params[l]
        W = jnp.asarray(W, jnp.float32)                            # (H, H)
        weight_args += [W, W.T, jnp.asarray(b, jnp.float32).reshape(hidden, 1)]
    wlast = jnp.asarray(params[-1][0], jnp.float32).reshape(hidden, 1)
    weight_args.append(wlast)

    weight_bytes = sum(int(np.prod(a.shape)) * 4 for a in weight_args)
    bm, B_pad = _choose_bm(B, hidden, n_tanh, weight_bytes)

    # Batch goes on the lane axis; pad (edge-replicate) to a lane-aligned size.
    xt = jnp.asarray(x, jnp.float32).T                             # (2, B)
    if B_pad != B:
        xt = jnp.pad(xt, ((0, 0), (0, B_pad - B)), mode="edge")

    grid = (B_pad // bm,)
    in_specs = [pl.BlockSpec((2, bm), lambda i: (0, i))]
    in_specs += [pl.BlockSpec(a.shape, lambda i: (0, 0)) for a in weight_args]
    out_specs = pl.BlockSpec((2, bm), lambda i: (0, i))

    # Explicit scoped-VMEM limit: weights (x2 pipeline buffers) + residuals/temps
    # for one batch tile, with headroom; capped at v7x physical VMEM.
    per_elem = (2 * n_tanh + 10) * hidden * 4
    vmem_limit = int(min(64 * 2**20,
                         max(32 * 2**20,
                             2 * weight_bytes + 2 * per_elem * bm + 8 * 2**20)))

    kernel = make_lnn_kernel(num_layers, eps)
    out_t = pl.pallas_call(
        kernel,
        out_shape=jax.ShapeDtypeStruct((2, B_pad), jnp.float32),
        grid=grid,
        in_specs=in_specs,
        out_specs=out_specs,
        compiler_params=pltpu.CompilerParams(
            dimension_semantics=("parallel",),
            vmem_limit_bytes=vmem_limit),
    )(xt, *weight_args)
    return out_t[:, :B].T                                          # (B, 2)


# ------------------------- pure-JAX reference -------------------------
def _mlp_apply(params, x_single):
    h = x_single
    n = len(params)
    for i, (W, b) in enumerate(params):
        h = h @ W.T + b
        if i < n - 1:
            h = jnp.tanh(h)
    return h[0]  # scalar (output dim 1)


def lnn_forward_ref(params, x, eps=EPS):
    lag = lambda xs: _mlp_apply(params, xs)
    grad_all = jax.vmap(jax.grad(lag))(x)
    H = jax.vmap(jax.hessian(lag))(x)
    dL_dq = grad_all[:, 0:1]
    d2L_dqv = H[:, 1, 0][:, None]
    d2L_dv2 = H[:, 1, 1][:, None]
    v = x[:, 1:2]
    a = (dL_dq - d2L_dqv * v) / (d2L_dv2 + eps)
    return jnp.concatenate([v, a], axis=1)


if __name__ == "__main__":
    B, INPUT_DIM, HIDDEN, NUM_LAYERS = 8, 2, 32, 3

    key = jax.random.PRNGKey(0)
    key, kx = jax.random.split(key)
    x = jax.random.normal(kx, (B, INPUT_DIM), jnp.float32)
    t = jnp.array(0.0, jnp.float32)  # unused by forward; kept for signature parity
    params = init_mlp_params(key, INPUT_DIM, HIDDEN, NUM_LAYERS)

    out = lnn_forward_pallas(t, x, params)
    out = jax.block_until_ready(out)

    ref = jax.block_until_ready(lnn_forward_ref(params, x))
    # Hidden-layer dots run at default (single-pass bf16) MXU precision; the
    # sensitive final projections / denominator are full f32 VPU, so this
    # tolerance is comfortable.
    np.testing.assert_allclose(np.asarray(out), np.asarray(ref),
                               rtol=2e-2, atol=2e-2)
    print("KERNEL_OK")
</pallas_src>

<mosaic_0001>
module attributes {stable_mosaic.version = 11 : i64} {
  func.func @kernel(%arg0: i32, %arg1: memref<2x128xf32, #tpu.memory_space<vmem>>, %arg2: memref<32x2xf32, #tpu.memory_space<vmem>>, %arg3: memref<32x1xf32, #tpu.memory_space<vmem>>, %arg4: memref<32x32xf32, #tpu.memory_space<vmem>>, %arg5: memref<32x32xf32, #tpu.memory_space<vmem>>, %arg6: memref<32x1xf32, #tpu.memory_space<vmem>>, %arg7: memref<32x1xf32, #tpu.memory_space<vmem>>, %arg8: memref<2x128xf32, #tpu.memory_space<vmem>>) attributes {dimension_semantics = [#tpu.dimension_semantics<parallel>], iteration_bounds = array<i64: 1>, scalar_prefetch = 0 : i64, scratch_operands = 0 : i64, tpu.core_type = #tpu.core_type<tc>, window_params = [{transform_indices = @transform_0, window_bounds = array<i64: 2, 128>}, {pipeline_mode = #tpu.pipeline_mode<synchronous>, transform_indices = @transform_1, window_bounds = array<i64: 32, 2>}, {pipeline_mode = #tpu.pipeline_mode<synchronous>, transform_indices = @transform_2, window_bounds = array<i64: 32, 1>}, {pipeline_mode = #tpu.pipeline_mode<synchronous>, transform_indices = @transform_3, window_bounds = array<i64: 32, 32>}, {pipeline_mode = #tpu.pipeline_mode<synchronous>, transform_indices = @transform_4, window_bounds = array<i64: 32, 32>}, {pipeline_mode = #tpu.pipeline_mode<synchronous>, transform_indices = @transform_5, window_bounds = array<i64: 32, 1>}, {pipeline_mode = #tpu.pipeline_mode<synchronous>, transform_indices = @transform_6, window_bounds = array<i64: 32, 1>}, {transform_indices = @transform_7, window_bounds = array<i64: 2, 128>}]} {
    %c0 = arith.constant 0 : index
    %c0_0 = arith.constant 0 : index
    %0 = vector.load %arg1[%c0, %c0_0] : memref<2x128xf32, #tpu.memory_space<vmem>>, vector<2x128xf32>
    %1 = vector.extract_strided_slice %0 {offsets = [0, 0], sizes = [1, 128], strides = [1, 1]} : vector<2x128xf32> to vector<1x128xf32>
    %2 = vector.extract_strided_slice %0 {offsets = [1, 0], sizes = [1, 128], strides = [1, 1]} : vector<2x128xf32> to vector<1x128xf32>
    %c0_1 = arith.constant 0 : index
    %c0_2 = arith.constant 0 : index
    %3 = vector.load %arg2[%c0_1, %c0_2] : memref<32x2xf32, #tpu.memory_space<vmem>>, vector<32x2xf32>
    %c0_3 = arith.constant 0 : index
    %c0_4 = arith.constant 0 : index
    %4 = vector.load %arg3[%c0_3, %c0_4] : memref<32x1xf32, #tpu.memory_space<vmem>>, vector<32x1xf32>
    %5 = vector.extract_strided_slice %3 {offsets = [0, 0], sizes = [32, 1], strides = [1, 1]} : vector<32x2xf32> to vector<32x1xf32>
    %6 = vector.extract_strided_slice %3 {offsets = [0, 1], sizes = [32, 1], strides = [1, 1]} : vector<32x2xf32> to vector<32x1xf32>
    %7 = vector.broadcast %5 : vector<32x1xf32> to vector<32x128xf32>
    %8 = vector.broadcast %1 : vector<1x128xf32> to vector<32x128xf32>
    %9 = arith.mulf %7, %8 : vector<32x128xf32>
    %10 = vector.broadcast %6 : vector<32x1xf32> to vector<32x128xf32>
    %11 = vector.broadcast %2 : vector<1x128xf32> to vector<32x128xf32>
    %12 = arith.mulf %10, %11 : vector<32x128xf32>
    %13 = arith.addf %9, %12 : vector<32x128xf32>
    %14 = vector.broadcast %4 : vector<32x1xf32> to vector<32x128xf32>
    %15 = arith.addf %13, %14 : vector<32x128xf32>
    %16 = math.tanh %15 : vector<32x128xf32>
    %17 = arith.mulf %16, %16 : vector<32x128xf32>
    %cst = arith.constant 1.000000e+00 : f32
    %18 = vector.broadcast %cst : f32 to vector<32x128xf32>
    %19 = arith.subf %18, %17 : vector<32x128xf32>
    %20 = vector.shape_cast %6 : vector<32x1xf32> to vector<32x1xf32>
    %21 = vector.broadcast %20 : vector<32x1xf32> to vector<32x128xf32>
    %22 = arith.mulf %19, %21 : vector<32x128xf32>
    %c0_5 = arith.constant 0 : index
    %c0_6 = arith.constant 0 : index
    %23 = vector.load %arg4[%c0_5, %c0_6] : memref<32x32xf32, #tpu.memory_space<vmem>>, vector<32x32xf32>
    %c0_7 = arith.constant 0 : index
    %c0_8 = arith.constant 0 : index
    %24 = vector.load %arg6[%c0_7, %c0_8] : memref<32x1xf32, #tpu.memory_space<vmem>>, vector<32x1xf32>
    %25 = tpu.concatenate %16, %22 in 1 : vector<32x128xf32>, vector<32x128xf32> -> vector<32x256xf32>
    %cst_9 = arith.constant dense<0.000000e+00> : vector<32x256xf32>
    %26 = tpu.matmul %23, %25, %cst_9 {dimension_numbers = #tpu.dot_dimension_numbers<[1], [0], [0], [1], [0, 0, 1, 1], [], []>} : vector<32x32xf32>, vector<32x256xf32>, vector<32x256xf32> -> vector<32x256xf32>
    %27 = vector.extract_strided_slice %26 {offsets = [0, 0], sizes = [32, 128], strides = [1, 1]} : vector<32x256xf32> to vector<32x128xf32>
    %28 = vector.broadcast %24 : vector<32x1xf32> to vector<32x128xf32>
    %29 = arith.addf %27, %28 : vector<32x128xf32>
    %30 = math.tanh %29 : vector<32x128xf32>
    %31 = arith.mulf %30, %30 : vector<32x128xf32>
    %cst_10 = arith.constant 1.000000e+00 : f32
    %32 = vector.broadcast %cst_10 : f32 to vector<32x128xf32>
    %33 = arith.subf %32, %31 : vector<32x128xf32>
    %34 = vector.extract_strided_slice %26 {offsets = [0, 128], sizes = [32, 128], strides = [1, 1]} : vector<32x256xf32> to vector<32x128xf32>
    %35 = arith.mulf %33, %34 : vector<32x128xf32>
    %c0_11 = arith.constant 0 : index
    %c0_12 = arith.constant 0 : index
    %36 = vector.load %arg7[%c0_11, %c0_12] : memref<32x1xf32, #tpu.memory_space<vmem>>, vector<32x1xf32>
    %37 = vector.shape_cast %36 : vector<32x1xf32> to vector<32x1xf32>
    %38 = vector.broadcast %37 : vector<32x1xf32> to vector<32x128xf32>
    %39 = arith.mulf %30, %30 : vector<32x128xf32>
    %cst_13 = arith.constant 1.000000e+00 : f32
    %40 = vector.broadcast %cst_13 : f32 to vector<32x128xf32>
    %41 = arith.subf %40, %39 : vector<32x128xf32>
    %42 = arith.mulf %38, %41 : vector<32x128xf32>
    %cst_14 = arith.constant -2.000000e+00 : f32
    %43 = vector.broadcast %cst_14 : f32 to vector<32x128xf32>
    %44 = arith.mulf %43, %30 : vector<32x128xf32>
    %45 = arith.mulf %44, %35 : vector<32x128xf32>
    %46 = arith.mulf %38, %45 : vector<32x128xf32>
    %c0_15 = arith.constant 0 : index
    %c0_16 = arith.constant 0 : index
    %47 = vector.load %arg5[%c0_15, %c0_16] : memref<32x32xf32, #tpu.memory_space<vmem>>, vector<32x32xf32>
    %48 = tpu.concatenate %42, %46 in 1 : vector<32x128xf32>, vector<32x128xf32> -> vector<32x256xf32>
    %cst_17 = arith.constant dense<0.000000e+00> : vector<32x256xf32>
    %49 = tpu.matmul %47, %48, %cst_17 {dimension_numbers = #tpu.dot_dimension_numbers<[1], [0], [0], [1], [0, 0, 1, 1], [], []>} : vector<32x32xf32>, vector<32x256xf32>, vector<32x256xf32> -> vector<32x256xf32>
    %50 = vector.extract_strided_slice %49 {offsets = [0, 0], sizes = [32, 128], strides = [1, 1]} : vector<32x256xf32> to vector<32x128xf32>
    %51 = vector.extract_strided_slice %49 {offsets = [0, 128], sizes = [32, 128], strides = [1, 1]} : vector<32x256xf32> to vector<32x128xf32>
    %52 = arith.mulf %16, %16 : vector<32x128xf32>
    %cst_18 = arith.constant 1.000000e+00 : f32
    %53 = vector.broadcast %cst_18 : f32 to vector<32x128xf32>
    %54 = arith.subf %53, %52 : vector<32x128xf32>
    %cst_19 = arith.constant -2.000000e+00 : f32
    %55 = vector.broadcast %cst_19 : f32 to vector<32x128xf32>
    %56 = arith.mulf %55, %16 : vector<32x128xf32>
    %57 = arith.mulf %56, %22 : vector<32x128xf32>
    %58 = arith.mulf %50, %54 : vector<32x128xf32>
    %59 = arith.mulf %51, %54 : vector<32x128xf32>
    %60 = arith.mulf %50, %57 : vector<32x128xf32>
    %61 = arith.addf %59, %60 : vector<32x128xf32>
    %62 = vector.broadcast %5 : vector<32x1xf32> to vector<32x128xf32>
    %63 = arith.mulf %58, %62 : vector<32x128xf32>
    %cst_20 = arith.constant dense<0.000000e+00> : vector<128xf32>
    %64 = vector.multi_reduction <add>, %63, %cst_20 [0] : vector<32x128xf32> to vector<128xf32>
    %65 = vector.shape_cast %64 : vector<128xf32> to vector<1x128xf32>
    %66 = vector.broadcast %5 : vector<32x1xf32> to vector<32x128xf32>
    %67 = arith.mulf %61, %66 : vector<32x128xf32>
    %cst_21 = arith.constant dense<0.000000e+00> : vector<128xf32>
    %68 = vector.multi_reduction <add>, %67, %cst_21 [0] : vector<32x128xf32> to vector<128xf32>
    %69 = vector.shape_cast %68 : vector<128xf32> to vector<1x128xf32>
    %70 = vector.broadcast %6 : vector<32x1xf32> to vector<32x128xf32>
    %71 = arith.mulf %61, %70 : vector<32x128xf32>
    %cst_22 = arith.constant dense<0.000000e+00> : vector<128xf32>
    %72 = vector.multi_reduction <add>, %71, %cst_22 [0] : vector<32x128xf32> to vector<128xf32>
    %73 = vector.shape_cast %72 : vector<128xf32> to vector<1x128xf32>
    %74 = arith.mulf %69, %2 : vector<1x128xf32>
    %75 = arith.subf %65, %74 : vector<1x128xf32>
    %cst_23 = arith.constant 1.000000e-01 : f32
    %76 = vector.broadcast %cst_23 : f32 to vector<1x128xf32>
    %77 = arith.addf %73, %76 : vector<1x128xf32>
    %78 = arith.divf %75, %77 : vector<1x128xf32>
    %79 = tpu.iota {dimensions = array<i32: 0>} : vector<2x128xi32>
    %c0_i32 = arith.constant 0 : i32
    %80 = vector.broadcast %c0_i32 : i32 to vector<2x128xi32>
    %81 = arith.cmpi eq, %79, %80 : vector<2x128xi32>
    %82 = vector.shape_cast %2 : vector<1x128xf32> to vector<1x128xf32>
    %83 = vector.broadcast %82 : vector<1x128xf32> to vector<2x128xf32>
    %84 = vector.shape_cast %78 : vector<1x128xf32> to vector<1x128xf32>
    %85 = vector.broadcast %84 : vector<1x128xf32> to vector<2x128xf32>
    %86 = arith.select %81, %83, %85 : vector<2x128xi1>, vector<2x128xf32>
    %c0_24 = arith.constant 0 : index
    %c0_25 = arith.constant 0 : index
    %87 = vector.load %arg8[%c0_24, %c0_25] : memref<2x128xf32, #tpu.memory_space<vmem>>, vector<2x128xf32>
    tpu.vector_store %arg8[%c0_24, %c0_25], %86 {strides = array<i32>} : memref<2x128xf32, #tpu.memory_space<vmem>>, vector<2x128xf32>,
    return
  }
  func.func @transform_0(%arg0: i32) -> (i32, i32) {
    %c0_i32 = arith.constant 0 : i32
    %c0_i32_0 = arith.constant 0 : i32
    return %c0_i32, %arg0 : i32, i32
  }
  func.func @transform_1(%arg0: i32) -> (i32, i32) {
    %c0_i32 = arith.constant 0 : i32
    %c0_i32_0 = arith.constant 0 : i32
    %c0_i32_1 = arith.constant 0 : i32
    return %c0_i32, %c0_i32_0 : i32, i32
  }
  func.func @transform_2(%arg0: i32) -> (i32, i32) {
    %c0_i32 = arith.constant 0 : i32
    %c0_i32_0 = arith.constant 0 : i32
    %c0_i32_1 = arith.constant 0 : i32
    return %c0_i32, %c0_i32_0 : i32, i32
  }
  func.func @transform_3(%arg0: i32) -> (i32, i32) {
    %c0_i32 = arith.constant 0 : i32
    %c0_i32_0 = arith.constant 0 : i32
    %c0_i32_1 = arith.constant 0 : i32
    return %c0_i32, %c0_i32_0 : i32, i32
  }
  func.func @transform_4(%arg0: i32) -> (i32, i32) {
    %c0_i32 = arith.constant 0 : i32
    %c0_i32_0 = arith.constant 0 : i32
    %c0_i32_1 = arith.constant 0 : i32
    return %c0_i32, %c0_i32_0 : i32, i32
  }
  func.func @transform_5(%arg0: i32) -> (i32, i32) {
    %c0_i32 = arith.constant 0 : i32
    %c0_i32_0 = arith.constant 0 : i32
    %c0_i32_1 = arith.constant 0 : i32
    return %c0_i32, %c0_i32_0 : i32, i32
  }
  func.func @transform_6(%arg0: i32) -> (i32, i32) {
    %c0_i32 = arith.constant 0 : i32
    %c0_i32_0 = arith.constant 0 : i32
    %c0_i32_1 = arith.constant 0 : i32
    return %c0_i32, %c0_i32_0 : i32, i32
  }
  func.func @transform_7(%arg0: i32) -> (i32, i32) {
    %c0_i32 = arith.constant 0 : i32
    %c0_i32_0 = arith.constant 0 : i32
    return %c0_i32, %arg0 : i32, i32
  }
}

</mosaic_0001>

<bundles_post_ra>
// kernel: tpu_custom_call.1
= control target key start
LH: loop header
LB: loop body
LE: loop exit
PB: predicated region body
PF: predicated region fallthrough
CT: control target
= control target key end

     0   :  { %v534_v3 = vmov 0   ;;  %s755_s0 = inlined_call_operand.vmem [shape: f32[2,128], index: 0, kind: input, shape index: {}]   ;;  %s756_s1 = inlined_call_operand.vmem [shape: f32[32,2], index: 1, kind: input, shape index: {}]   ;;  %s757_s2 = inlined_call_operand.vmem [shape: f32[32,1], index: 2, kind: input, shape index: {}]   ;;  %s758_s3 = inlined_call_operand.vmem [shape: f32[32,32], index: 3, kind: input, shape index: {}]   ;;  %s759_s4 = inlined_call_operand.vmem [shape: f32[32,32], index: 4, kind: input, shape index: {}]   ;;  %s760_s5 = inlined_call_operand.vmem [shape: f32[32,1], index: 5, kind: input, shape index: {}]   ;;  %s761_s6 = inlined_call_operand.vmem [shape: f32[32,1], index: 6, kind: input, shape index: {}]   ;;  %s762_s7 = inlined_call_operand.hbm [shape: f32[2,128], index: 7, kind: output, shape index: {}]  }
   0x1   :  { %v31_v0 = vld [vmem:[%s756_s1 + $0x18] sm:$0xff]  ;;  %v30_v1 = vld [vmem:[%s756_s1 + $0x10] sm:$0xff]  ;;  %v29_v2 = vld [vmem:[%s756_s1 + $0x8] sm:$0xff]  ;;  %485 = vset.pattern.permute.xlu2 %v534_v3  ;;  %483 = vset.pattern.permute.xlu1 %v534_v3 }
   0x2   :  { %481 = vset.pattern.permute.xlu0 %v534_v3  ;;  %48 = vperm.xlu1 %483, %v30_v1  }
   0x3   :  { %53 = vperm.xlu0 %481, %v31_v0   ;;  %43 = vperm.xlu2 %485, %v29_v2  }
   0x4   :  { %12 = vsyncpa [#allocation3], 0  ;;  %v535_v4 = vmov 1   ;;  %v28_v5 = vld [vmem:[%s756_s1] sm:$0xff]  ;;  %v35_v6 = vld [vmem:[%s757_s2 + $0x18] sm:$0xff]  ;;  %vm134_vm0 = vcmask 261120  }
   0x5   :  { %v34_v7 = vld [vmem:[%s757_s2 + $0x10] sm:$0xff]  ;;  %v32_v8 = vld [vmem:[%s757_s2] sm:$0xff]  ;;  %v33_v9 = vld [vmem:[%s757_s2 + $0x8] sm:$0xff]  ;;  %s453_s23 = sshll.u32 %s762_s7, 4  ;;  %s454_s23 = int_to_ptr.hbm [resolvable:$true] %s453_s23 }
   0x6   :  { %v133_v10 = vld [vmem:[%s760_s5 + $0x18] sm:$0xff]  ;;  %v132_v12 = vld [vmem:[%s760_s5 + $0x10] sm:$0xff]  ;;  %v131_v13 = vld [vmem:[%s760_s5 + $0x8] sm:$0xff] }
   0x7   :  { %v248_v11 = vld [vmem:[%s761_s6 + $0x18] sm:$0xff]  ;;  %v245_v14 = vld [vmem:[%s761_s6] sm:$0xff]  ;;  %v247_v16 = vld [vmem:[%s761_s6 + $0x10] sm:$0xff] }
   0x8   :  { %v130_v15 = vld [vmem:[%s760_s5] sm:$0xff]  ;;  %v246_v17 = vld [vmem:[%s761_s6 + $0x8] sm:$0xff] }
   0x9   :  { %v632_v20 = vld [vmem:[%s755_s0] sm:$0x3] }
   0xa   :  { %484 = vset.pattern.permute.xlu1 %v535_v4  ;;  %v56_v21 = vperm.slane %v632_v20, 0  ;;  %v636_v22 = vperm.slane %v632_v20, 1 }
   0xb   :  { %482 = vset.pattern.permute.xlu0 %v535_v4  ;;  %486 = vset.pattern.permute.xlu2 %v535_v4 }
   0xc   :  { %74 = vperm.xlu0 %482, %v31_v0   ;;  %70 = vperm.xlu1 %484, %v30_v1   ;;  %v126_v1 = vld [vmem:[%s758_s3] sm:$0xff] }
   0xd   :  { %66 = vperm.xlu2 %486, %v29_v2  }
  0x14   :  { %487 = vset.pattern.permute.xlu1 %v534_v3  ;;  %62 = vperm.xlu0 %482, %v28_v5  }
  0x15   :  { %488 = vset.pattern.permute.xlu2 %v534_v3  ;;  %103 = vperm.xlu1 %487, %v35_v6  }
  0x16   :  { %38 = vperm.xlu2 %488, %v28_v5  }
  0x1c   :  { %489 = vset.pattern.permute.xlu0 %v534_v3 }
  0x1d   :  { %98 = vperm.xlu1 %487, %v34_v7   ;;  %88 = vperm.xlu0 %489, %v32_v8  }
  0x1e   :  { %93 = vperm.xlu2 %488, %v33_v9  }
  0x25   :  { %222 = vperm.xlu1 %487, %v133_v10   ;;  %266 = vperm.xlu0 %489, %v248_v11   ;;  %v127_v10 = vld [vmem:[%s758_s3 + $0x8] sm:$0xff]  ;;  %v128_v11 = vld [vmem:[%s758_s3 + $0x10] sm:$0xff] }
  0x26   :  { %217 = vperm.xlu2 %488, %v132_v12   ;;  %v129_v12 = vld [vmem:[%s758_s3 + $0x18] sm:$0xff] }
  0x2d   :  { %212 = vperm.xlu1 %487, %v131_v13   ;;  %251 = vperm.xlu0 %489, %v245_v14  }
  0x2e   :  { %207 = vperm.xlu2 %488, %v130_v15  }
  0x35   :  { %261 = vperm.xlu1 %487, %v247_v16  }
  0x36   :  { %256 = vperm.xlu2 %488, %v246_v17  }
  0x5d   :  { %v625_v18 = vpop.permute.xlu2 %43 }
  0x5e   :  { %v58_v24 = vmul.f32 %v56_v21, %v625_v18 }
  0x67   :  { %v627_v19 = vpop.permute.xlu2 %66 }
  0x68   :  { %v79_v25 = vmul.f32 %v636_v22, %v627_v19 }
  0x6a   :  { %v83_v28 = vadd.f32 %v79_v25, %v58_v24 }
  0x70   :  { %v638_v23 = vpop.permute.xlu2 %38 }
  0x71   :  { %v57_v45 = vmul.f32 %v56_v21, %v638_v23 }
  0x74   :  { %v643_v26 = vpop.permute.xlu1 %48 }
  0x75   :  { %v645_v27 = vpop.permute.xlu0 %53  ;;  %v59_v48 = vmul.f32 %v56_v21, %v643_v26 }
  0x76   :  { %v60_v36 = vmul.f32 %v56_v21, %v645_v27 }
  0x78   :  { %v94_v29 = vpop.permute.xlu2 %93 }
  0x79   :  { %v107_v30 = vadd.f32 %v94_v29, %v83_v28 }
  0x7b   :  { %490 = vtanh.f32 %v107_v30 }
  0x7e   :  { %v647_v31 = vpop.permute.xlu0 %74  ;;  %v649_v32 = vpop.permute.xlu1 %70 }
  0x7f   :  { %v81_v34 = vmul.f32 %v636_v22, %v647_v31  ;;  %v80_v46 = vmul.f32 %v636_v22, %v649_v32 }
  0x80   :  { %v218_v16 = vpop.permute.xlu2 %217 }
  0x81   :  { %v491_v33 = vpop.eup %490  ;;  %v85_v40 = vadd.f32 %v81_v34, %v60_v36  ;;  %v84_v49 = vadd.f32 %v80_v46, %v59_v48 }
  0x82   :  { %v115_v35 = vmul.f32 %v491_v33, %v491_v33  ;;  %v360_v38 = vmul.f32 -2.0, %v491_v33 }
  0x84   :  { %v654_v37 = vsub.f32 1.0, %v115_v35 }
  0x86   :  { %v656_v39 = vpop.permute.xlu0 %62  ;;  %v123_v41 = vmul.f32 %v654_v37, %v627_v19 }
  0x87   :  { %v104_v42 = vpop.permute.xlu1 %103  ;;  %v78_v47 = vmul.f32 %v636_v22, %v656_v39 }
  0x88   :  { %v109_v43 = vadd.f32 %v104_v42, %v85_v40  ;;  %v660_v44 = vmul.f32 %v360_v38, %v123_v41  ;;  %v208_v29 = vpop.permute.xlu2 %207 }
  0x89   :  { %v82_v50 = vadd.f32 %v78_v47, %v57_v45 }
  0x8a   :  { %492 = vtanh.f32 %v109_v43 }
  0x8f   :  { %v99_v51 = vpop.permute.xlu1 %98  ;;  %v89_v52 = vpop.permute.xlu0 %88 }
  0x90   :  { %v493_v53 = vpop.eup %492  ;;  %v108_v54 = vadd.f32 %v99_v51, %v84_v49  ;;  %v106_v55 = vadd.f32 %v89_v52, %v82_v50 }
  0x91   :  { %159 = vmatpush.msra.mxu0 %v493_v53  ;;  %v117_v56 = vmul.f32 %v493_v53, %v493_v53  ;;  %v362_v59 = vmul.f32 -2.0, %v493_v53 }
  0x92   :  { %494 = vtanh.f32 %v108_v54 }
  0x93   :  { %496 = vtanh.f32 %v106_v55  ;;  %v668_v57 = vsub.f32 1.0, %v117_v56 }
  0x95   :  { %v125_v58 = vmul.f32 %v668_v57, %v647_v31 }
  0x97   :  { %188 = vmatpush.msra.mxu1 %v125_v58  ;;  %v672_v60 = vmul.f32 %v362_v59, %v125_v58  ;;  %v223_v14 = vpop.permute.xlu1 %222  ;;  %v267_v48 = vpop.permute.xlu0 %266 }
  0x98   :  { %v495_v61 = vpop.eup %494 }
  0x99   :  { %v497_v62 = vpop.eup %496  ;;  %160 = vmatpush.msra.mxu0 %v495_v61  ;;  %v116_v63 = vmul.f32 %v495_v61, %v495_v61  ;;  %v361_v5 = vmul.f32 -2.0, %v495_v61 }
  0x9a   :  { %v114_v0 = vmul.f32 %v497_v62, %v497_v62  ;;  %v359_v7 = vmul.f32 -2.0, %v497_v62 }
  0x9b   :  { %161 = vmatpush.msra.mxu0 %v491_v33  ;;  %v677_v2 = vsub.f32 1.0, %v116_v63 }
  0x9c   :  { %v679_v3 = vsub.f32 1.0, %v114_v0 }
  0x9d   :  { %162 = vmatpush.msra.mxu0 %v497_v62  ;;  %v124_v4 = vmul.f32 %v677_v2, %v649_v32 }
  0x9e   :  { %462 = vmatmul.msk.f32.vlgmr.msra.gmra.mxu0 %vm134_vm0, %v126_v1  ;;  %v122_v6 = vmul.f32 %v679_v3, %v656_v39 }
  0x9f   :  { %189 = vmatpush.msra.mxu1 %v124_v4  ;;  %v686_v8 = vmul.f32 %v361_v5, %v124_v4  ;;  %v213_v21 = vpop.permute.xlu1 %212 }
  0xa0   :  { %v688_v9 = vmul.f32 %v359_v7, %v122_v6 }
  0xa1   :  { %190 = vmatpush.msra.mxu1 %v123_v41 }
  0xa3   :  { %191 = vmatpush.msra.mxu1 %v122_v6  ;;  %v257_v6 = vpop.permute.xlu2 %256 }
  0xa4   :  { %466 = vmatmul.msk.f32.vlgmr.msra.gmra.mxu1 %vm134_vm0, %v126_v1 }
  0xa6   :  { %463 = vmatmul.msk.f32.gmra.mxu0 %vm134_vm0, %v127_v10 }
  0xa7   :  { %v262_v62 = vpop.permute.xlu1 %261 }
  0xac   :  { %467 = vmatmul.msk.f32.gmra.mxu1 %vm134_vm0, %v127_v10 }
  0xae   :  { %464 = vmatmul.msk.f32.gmra.mxu0 %vm134_vm0, %v128_v11 }
  0xb4   :  { %468 = vmatmul.msk.f32.gmra.mxu1 %vm134_vm0, %v128_v11 }
  0xb6   :  { %465 = vmatmul.msk.f32.gmra.mxu0 %vm134_vm0, %v129_v12 }
  0xbc   :  { %469 = vmatmul.msk.f32.gmra.mxu1 %vm134_vm0, %v129_v12 }
 0x11b   :  { %v164_v13 = vpop.f32.mrf.mxu0 }
 0x11c   :  { %v225_v33 = vadd.f32 %v208_v29, %v164_v13  ;;  %v252_v13 = vpop.permute.xlu0 %251  ;;  %v288_v29 = vld [vmem:[%s759_s4 + $0x18] sm:$0xff] }
 0x121   :  { %v193_v15 = vpop.f32.mrf.mxu1 }
 0x123   :  { %v167_v17 = vpop.f32.mrf.mxu0 }
 0x124   :  { %v226_v25 = vadd.f32 %v213_v21, %v167_v17 }
 0x129   :  { %v196_v24 = vpop.f32.mrf.mxu1 }
 0x12b   :  { %v170_v28 = vpop.f32.mrf.mxu0 }
 0x12c   :  { %v227_v30 = vadd.f32 %v218_v16, %v170_v28  ;;  %v287_v28 = vld [vmem:[%s759_s4 + $0x10] sm:$0xff] }
 0x12e   :  { %498 = vtanh.f32 %v227_v30 }
 0x12f   :  { %500 = vtanh.f32 %v226_v25  ;;  %v286_v25 = vld [vmem:[%s759_s4 + $0x8] sm:$0xff] }
 0x130   :  { %502 = vtanh.f32 %v225_v33 }
 0x131   :  { %v199_v38 = vpop.f32.mrf.mxu1 }
 0x133   :  { %v173_v34 = vpop.f32.mrf.mxu0 }
 0x134   :  { %v499_v35 = vpop.eup %498  ;;  %v228_v36 = vadd.f32 %v223_v14, %v173_v34 }
 0x135   :  { %v501_v40 = vpop.eup %500  ;;  %v235_v42 = vmul.f32 %v499_v35, %v499_v35  ;;  %v275_v56 = vmul.f32 -2.0, %v499_v35 }
 0x136   :  { %504 = vtanh.f32 %v228_v36  ;;  %v503_v41 = vpop.eup %502  ;;  %v234_v43 = vmul.f32 %v501_v40, %v501_v40  ;;  %v274_v0 = vmul.f32 -2.0, %v501_v40 }
 0x137   :  { %v233_v45 = vmul.f32 %v503_v41, %v503_v41  ;;  %v239_v46 = vsub.f32 1.0, %v235_v42  ;;  %v273_v7 = vmul.f32 -2.0, %v503_v41 }
 0x138   :  { %v238_v49 = vsub.f32 1.0, %v234_v43 }
 0x139   :  { %v237_v51 = vsub.f32 1.0, %v233_v45  ;;  %v202_v52 = vpop.f32.mrf.mxu1  ;;  %v243_v53 = vmul.f32 %v239_v46, %v199_v38  ;;  %v271_v4 = vmul.f32 %v262_v62, %v239_v46 }
 0x13a   :  { %v242_v55 = vmul.f32 %v238_v49, %v196_v24  ;;  %v270_v11 = vmul.f32 %v257_v6, %v238_v49 }
 0x13b   :  { %v241_v63 = vmul.f32 %v237_v51, %v193_v15  ;;  %v279_v1 = vmul.f32 %v275_v56, %v243_v53  ;;  %v269_v16 = vmul.f32 %v252_v13, %v237_v51  ;;  %v285_v15 = vld [vmem:[%s759_s4] sm:$0xff]  ;;  %s536_s4 = smov [#allocation2]  }
 0x13c   :  { %v505_v47 = vpop.eup %504  ;;  %v278_v10 = vmul.f32 %v274_v0, %v242_v55  ;;  %s451_s21 = sshll.u32 %s536_s4, 4  ;;  %s452_s21 = int_to_ptr.vmem [resolvable:$true] %s451_s21 }
 0x13d   :  { %v236_v50 = vmul.f32 %v505_v47, %v505_v47  ;;  %v276_v61 = vmul.f32 -2.0, %v505_v47  ;;  %v277_v14 = vmul.f32 %v273_v7, %v241_v63  ;;  %v283_v17 = vmul.f32 %v279_v1, %v262_v62 }
 0x13e   :  { %v282_v21 = vmul.f32 %v278_v10, %v257_v6 }
 0x13f   :  { %v240_v54 = vsub.f32 1.0, %v236_v50  ;;  %v281_v24 = vmul.f32 %v277_v14, %v252_v13 }
 0x141   :  { %v244_v58 = vmul.f32 %v240_v54, %v202_v52  ;;  %v272_v59 = vmul.f32 %v267_v48, %v240_v54 }
 0x143   :  { %313 = vmatpush.msra.mxu2 %v272_v59  ;;  %v280_v5 = vmul.f32 %v276_v61, %v244_v58 }
 0x145   :  { %314 = vmatpush.msra.mxu2 %v271_v4  ;;  %v284_v12 = vmul.f32 %v280_v5, %v267_v48 }
 0x147   :  { %315 = vmatpush.msra.mxu2 %v270_v11  ;;  %342 = vmatpush.msra.mxu3 %v284_v12 }
 0x149   :  { %316 = vmatpush.msra.mxu2 %v269_v16  ;;  %343 = vmatpush.msra.mxu3 %v283_v17 }
 0x14a   :  { %470 = vmatmul.msk.f32.vlgmr.msra.gmra.mxu2 %vm134_vm0, %v285_v15 }
 0x14b   :  { %344 = vmatpush.msra.mxu3 %v282_v21 }
 0x14d   :  { %345 = vmatpush.msra.mxu3 %v281_v24 }
 0x14e   :  { %474 = vmatmul.msk.f32.vlgmr.msra.gmra.mxu3 %vm134_vm0, %v285_v15 }
 0x152   :  { %471 = vmatmul.msk.f32.gmra.mxu2 %vm134_vm0, %v286_v25 }
 0x156   :  { %475 = vmatmul.msk.f32.gmra.mxu3 %vm134_vm0, %v286_v25 }
 0x15a   :  { %472 = vmatmul.msk.f32.gmra.mxu2 %vm134_vm0, %v287_v28 }
 0x15e   :  { %476 = vmatmul.msk.f32.gmra.mxu3 %vm134_vm0, %v287_v28 }
 0x162   :  { %473 = vmatmul.msk.f32.gmra.mxu2 %vm134_vm0, %v288_v29 }
 0x166   :  { %477 = vmatmul.msk.f32.gmra.mxu3 %vm134_vm0, %v288_v29 }
 0x1cd   :  { %v318_v30 = vpop.f32.mrf.mxu2 }
 0x1ce   :  { %v375_v36 = vmul.f32 %v688_v9, %v318_v30  ;;  %v367_v63 = vmul.f32 %v318_v30, %v679_v3 }
 0x1d1   :  { %v347_v33 = vpop.f32.mrf.mxu3 }
 0x1d2   :  { %v371_v35 = vmul.f32 %v347_v33, %v679_v3 }
 0x1d4   :  { %v379_v40 = vadd.f32 %v375_v36, %v371_v35 }
 0x1d5   :  { %v321_v34 = vpop.f32.mrf.mxu2 }
 0x1d6   :  { %v376_v41 = vmul.f32 %v660_v44, %v321_v34  ;;  %v396_v46 = vmul.f32 %v379_v40, %v638_v23  ;;  %v409_v47 = vmul.f32 %v379_v40, %v656_v39  ;;  %v368_v39 = vmul.f32 %v321_v34, %v654_v37 }
 0x1d8   :  { %v384_v1 = vmul.f32 %v368_v39, %v625_v18 }
 0x1d9   :  { %v350_v38 = vpop.f32.mrf.mxu3 }
 0x1da   :  { %v372_v42 = vmul.f32 %v350_v38, %v654_v37  ;;  %v383_v37 = vmul.f32 %v367_v63, %v638_v23  ;;  %v440_v38 = vlaneseq }
 0x1dc   :  { %v380_v43 = vadd.f32 %v376_v41, %v372_v42  ;;  %v387_v10 = vadd.f32 %v384_v1, %v383_v37 }
 0x1dd   :  { %v324_v45 = vpop.f32.mrf.mxu2 }
 0x1de   :  { %v397_v48 = vmul.f32 %v380_v43, %v625_v18  ;;  %v410_v49 = vmul.f32 %v380_v43, %v627_v19  ;;  %v377_v9 = vmul.f32 %v686_v8, %v324_v45  ;;  %v369_v8 = vmul.f32 %v324_v45, %v677_v2 }
 0x1e0   :  { %v400_v50 = vadd.f32 %v397_v48, %v396_v46  ;;  %v413_v51 = vadd.f32 %v410_v49, %v409_v47  ;;  %v385_v6 = vmul.f32 %v369_v8, %v643_v26  ;;  %v441_v47 = vshrl.u32 %v440_v38, 7 }
 0x1e1   :  { %v353_v52 = vpop.f32.mrf.mxu3 }
 0x1e2   :  { %v373_v53 = vmul.f32 %v353_v52, %v677_v2  ;;  %v388_v2 = vadd.f32 %v387_v10, %v385_v6  ;;  %vm442_vm5 = vcmp.eq.s32.totalorder %v441_v47, 0 }
 0x1e4   :  { %v381_v44 = vadd.f32 %v377_v9, %v373_v53 }
 0x1e5   :  { %v327_v56 = vpop.f32.mrf.mxu2 }
 0x1e6   :  { %v398_v54 = vmul.f32 %v381_v44, %v643_v26  ;;  %v411_v55 = vmul.f32 %v381_v44, %v649_v32  ;;  %v378_v19 = vmul.f32 %v672_v60, %v327_v56  ;;  %v370_v4 = vmul.f32 %v327_v56, %v668_v57 }
 0x1e8   :  { %v401_v58 = vadd.f32 %v400_v50, %v398_v54  ;;  %v414_v59 = vadd.f32 %v413_v51, %v411_v55  ;;  %v386_v3 = vmul.f32 %v370_v4, %v645_v27 }
 0x1e9   :  { %v356_v61 = vpop.f32.mrf.mxu3 }
 0x1ea   :  { %v374_v62 = vmul.f32 %v356_v61, %v668_v57  ;;  %v389_v18 = vadd.f32 %v388_v2, %v386_v3 }
 0x1ec   :  { %v382_v0 = vadd.f32 %v378_v19, %v374_v62  ;;  %v390_v17 = vrot.slane %v389_v18, 4 }
 0x1ee   :  { %v399_v32 = vmul.f32 %v382_v0, %v645_v27  ;;  %v412_v5 = vmul.f32 %v382_v0, %v647_v31  ;;  %v391_v23 = vadd.f32 %v390_v17, %v389_v18 }
 0x1f0   :  { %v402_v60 = vadd.f32 %v401_v58, %v399_v32  ;;  %v415_v7 = vadd.f32 %v414_v59, %v412_v5  ;;  %v392_v25 = vrot.slane %v391_v23, 2 }
 0x1f2   :  { %v416_v11 = vrot.slane %v415_v7, 4  ;;  %v403_v12 = vrot.slane %v402_v60, 4  ;;  %v393_v29 = vadd.f32 %v392_v25, %v391_v23 }
 0x1f4   :  { %v417_v13 = vadd.f32 %v416_v11, %v415_v7  ;;  %v404_v57 = vadd.f32 %v403_v12, %v402_v60  ;;  %v394_v34 = vrot.slane %v393_v29, 1 }
 0x1f6   :  { %v418_v14 = vrot.slane %v417_v13, 2  ;;  %v405_v31 = vrot.slane %v404_v57, 2  ;;  %v395_v43 = vadd.f32 %v394_v34, %v393_v29 }
 0x1f8   :  { %v419_v16 = vadd.f32 %v418_v14, %v417_v13  ;;  %v406_v26 = vadd.f32 %v405_v31, %v404_v57 }
 0x1fa   :  { %v420_v15 = vrot.slane %v419_v16, 1  ;;  %v407_v28 = vrot.slane %v406_v26, 1 }
 0x1fc   :  { %v421_v21 = vadd.f32 %v420_v15, %v419_v16  ;;  %v408_v30 = vadd.f32 %v407_v28, %v406_v26 }
 0x1fe   :  { %v424_v24 = vadd.f32 0.1, %v421_v21  ;;  %v422_v40 = vmul.f32 %v408_v30, %v632_v20 }
 0x200   :  { %506 = vrcp.f32 %v424_v24  ;;  %v436_v36 = vand.u32 2147483648, %v424_v24  ;;  %v434_v42 = vand.u32 2147483647, %v424_v24  ;;  %vm430_vm2 = vweird.f32 %v424_v24 }
 0x201   :  { %v423_v48 = vsub.f32 %v395_v43, %v422_v40 }
 0x202   :  { %v437_v46 = vor.u32 1.1754944e-38, %v436_v36  ;;  %vm435_vm4 = vcmp.eq.f32.partialorder %v434_v42, 8.507059e+37 }
 0x206   :  { %v507_v27 = vpop.eup %506 }
 0x207   :  { %v426_v33 = vmul.f32 %v507_v27, %v424_v24  ;;  %vm431_vm1 = vweird.f32 %v507_v27 }
 0x208   :  { %vm432_vm3 = vmor %vm430_vm2, %vm431_vm1 }
 0x209   :  { %v427_v35 = vsub.f32 1.0, %v426_v33 }
 0x20b   :  { %v428_v41 = vmul.f32 %v507_v27, %v427_v35 }
 0x20d   :  { %v429_v45 = vadd.f32 %v507_v27, %v428_v41 }
 0x20f   :  { %v433_v49 = vsel %vm432_vm3, %v507_v27, %v429_v45 }
 0x210   :  { %v438_v50 = vsel %vm435_vm4, %v437_v46, %v433_v49 }
 0x211   :  { %v439_v51 = vmul.f32 %v438_v50, %v423_v48 }
 0x213   :  { %v443_v20 = vperm.slane %v439_v51, 1 }
 0x215   :  { %v444_v52 = vsel %vm442_vm5, %v636_v22, %v443_v20 }
 0x216   :  { %445 = vst [vmem:[#allocation2] sm:$0x3] %v444_v52 }
 0x217   :  { %456 = dma.vmem_to_hbm [thread:$0]  %s452_s21, 32, %s454_s23, [#allocation3]  }
 0x218   :  { %532 = dma.done.wait [#allocation3], 32  }
 0x219   :  { %533 = vsyncadd [#allocation3], 4294967264 }
 0x21a   :  { %461 = vsyncpa [#allocation3], 1 }

</bundles_post_ra>
